<compile_context>
chip_gen: v5e
topology: v5e:2x2
jax: 0.10.0
libtpu: 0.0.40
codegen_flags: <defaults>
</compile_context>

<pallas_src>
import functools

import numpy as np
import jax
import jax.numpy as jnp
from jax.experimental import pallas as pl
from jax.experimental.pallas import tpu as pltpu

LEAKY_SLOPE = 0.01                   # nn.LeakyReLU default
BN_EPS = 1e-5                        # nn.BatchNorm2d default


def _round_up(x, m):
    return (x + m - 1) // m * m


def _cdiv(a, b):
    return -(-a // b)


def _vmem_limit_bytes():
    """Generation-aware scoped-VMEM budget (<=48 MiB v7x, <=96 MiB v5e/v6e)."""
    cap = None
    try:
        info = pltpu.get_tpu_info()
        cap = getattr(info, "vmem_capacity_bytes", None)
    except Exception:
        cap = None
    if not cap:
        cap = 64 * 1024 * 1024           # conservative (v7x per-TC VMEM)
    return min((int(cap) * 3) // 4, 96 * 1024 * 1024)


def _bilinear_matrix(in_size, out_size, pad_before, pad_after):
    """Rows of the (F.pad ∘ bilinear-upsample) operator, align_corners=True."""
    total = out_size + pad_before + pad_after
    m = np.zeros((total, in_size), dtype=np.float32)
    scale = 0.0 if (out_size == 1 or in_size == 1) else (in_size - 1) / (out_size - 1)
    for i in range(out_size):
        src = i * scale
        i0 = min(int(np.floor(src)), in_size - 1)
        i1 = min(i0 + 1, in_size - 1)
        f = src - i0
        m[pad_before + i, i0] += 1.0 - f
        m[pad_before + i, i1] += f
    return m


def _pick_tiling(L, Wp, cin_p, cout_p, tile_lanes, vmem_budget):
    """Halo width, lanes-per-tile, padded lane count and grid length."""
    PAD = _round_up(Wp + 1, 128)
    # Halo invariant: the PAD-wide prev/next views must cover the largest conv
    # shift (Wp+1); clamped-edge halo garbage is only ever read for lanes that
    # the interior mask later zeroes.
    assert PAD >= Wp + 1
    # Rough per-lane VMEM bytes: double-buffered x/y/mask blocks + f32 extended
    # slab, 9-tap stack and f32 conv output held inside the kernel.
    per_lane = (2 * (2 * cin_p + 4 * cout_p + 4)
                + 4 * cin_p + 36 * cin_p + 8 * cout_p)
    max_lanes = max(PAD, (vmem_budget // 2) // per_lane)
    want = max(PAD, min(int(tile_lanes), max_lanes))
    R = max(1, want // PAD)                       # PAD-wide blocks per tile
    Lb = _cdiv(L, PAD)                            # blocks needed to cover L
    if Lb >= 2:
        R = min(R, (Lb + 1) // 2)                 # grid length >= 2 (v7x: 2 TCs)
    T = _cdiv(Lb, R)
    TL = R * PAD
    return PAD, TL, T * TL, T


# ---------------------------------------------------------------------------
# Kernel: [optional folded-BN + LeakyReLU + border re-zero] -> 3x3 conv with
# the 9 taps stacked into a single MXU matmul -> per-tile per-channel partial
# BN sums.  Layout: (C, lanes), lanes = flattened (n, h, w) over zero-bordered
# (H+2, W+2) images; halo lanes come from PAD-wide prev/next views.
# ---------------------------------------------------------------------------
def _conv_block_kernel(*refs, TL, PAD, SHIFTS, pre_act):
    f32 = jnp.float32
    if pre_act:
        xp, xc, xn, mp, mc, mn, sc, sh, w, y_ref, st_ref = refs
    else:
        xp, xc, xn, mc, w, y_ref, st_ref = refs

    # Extended slab: [prev halo | this tile | next halo] -> (Cin_p, PAD+TL+PAD)
    ext = jnp.concatenate([xp[...], xc[...], xn[...]], axis=1).astype(f32)
    if pre_act:
        # Folded BN (scale/shift) + LeakyReLU, then re-zero the image borders /
        # lane padding so the conv taps read exact zeros across them.
        mext = jnp.concatenate([mp[...], mc[...], mn[...]], axis=1)
        z = ext * sc[...] + sh[...]
        ext = jnp.where(z > 0, z, LEAKY_SLOPE * z) * mext

    # 9 shifted taps stacked -> one (9*Cin_p, TL) slab, one MXU matmul.
    stack = jnp.concatenate([ext[:, PAD + s:PAD + s + TL] for s in SHIFTS], axis=0)
    y = jnp.dot(w[...], stack, preferred_element_type=f32)        # (Cout_p, TL)

    ym = y * mc[...]                          # zero borders / padded lanes
    y_ref[...] = ym.astype(y_ref.dtype)

    # Per-tile BN partial sums; lane-dense 128-wide store (no masked vst).
    s1 = jnp.sum(ym, axis=1, keepdims=True)
    s2 = jnp.sum(ym * ym, axis=1, keepdims=True)
    st = jnp.concatenate([s1, s2], axis=0)                        # (2*Cout_p, 1)
    st_ref[...] = jnp.broadcast_to(st, st_ref.shape[1:])[None]


def _conv_pass(x2d, mask, w_st, Wp, n_valid, TL, PAD, vmem_limit,
               y_dtype, scale=None, shift=None):
    """One conv block (optionally preceded by folded BN+LeakyReLU), tiled over lanes."""
    cin_p, L_pad = x2d.shape
    cout_p = w_st.shape[0]
    R = TL // PAD             # PAD-wide blocks per tile
    nb = L_pad // PAD         # total PAD-wide blocks
    T = L_pad // TL
    pre_act = scale is not None
    shifts = tuple(dy * Wp + dx for dy in (-1, 0, 1) for dx in (-1, 0, 1))

    prev_map = lambda i: (0, jnp.maximum(i * R - 1, 0))     # clamped at left edge
    cur_map = lambda i: (0, i)
    next_map = lambda i: (0, jnp.minimum((i + 1) * R, nb - 1))  # clamped at right edge

    in_specs = [pl.BlockSpec((cin_p, PAD), prev_map),
                pl.BlockSpec((cin_p, TL), cur_map),
                pl.BlockSpec((cin_p, PAD), next_map)]
    args = [x2d, x2d, x2d]
    if pre_act:
        in_specs += [pl.BlockSpec((1, PAD), prev_map),
                     pl.BlockSpec((1, TL), cur_map),
                     pl.BlockSpec((1, PAD), next_map),
                     pl.BlockSpec(scale.shape, lambda i: (0, 0)),
                     pl.BlockSpec(shift.shape, lambda i: (0, 0))]
        args += [mask, mask, mask, scale, shift]
    else:
        in_specs += [pl.BlockSpec((1, TL), cur_map)]
        args += [mask]
    in_specs.append(pl.BlockSpec(w_st.shape, lambda i: (0, 0)))
    args.append(w_st)

    y, st = pl.pallas_call(
        functools.partial(_conv_block_kernel, TL=TL, PAD=PAD,
                          SHIFTS=shifts, pre_act=pre_act),
        grid=(T,),
        in_specs=in_specs,
        out_specs=(pl.BlockSpec((cout_p, TL), lambda i: (0, i)),
                   pl.BlockSpec((1, 2 * cout_p, 128), lambda i: (i, 0, 0))),
        out_shape=(jax.ShapeDtypeStruct((cout_p, L_pad), y_dtype),
                   jax.ShapeDtypeStruct((T, 2 * cout_p, 128), jnp.float32)),
        compiler_params=pltpu.CompilerParams(
            dimension_semantics=("parallel",),
            vmem_limit_bytes=vmem_limit),
    )(*args)

    # Tiny cross-tile reduction + BN stats (per channel) in XLA.
    s = jnp.sum(st[:, :, 0], axis=0)                        # (2*Cout_p,)
    mean = (s[:cout_p] / jnp.float32(n_valid))[:, None]
    # Note: E[y^2]-mean^2 is the cancellation-prone form; fine in f32 for
    # BN-scale activations (switch to a shifted/Welford form if needed).
    var = (s[cout_p:] / jnp.float32(n_valid))[:, None] - mean * mean
    return y, mean, var


@functools.partial(jax.jit, static_argnames=("tile_lanes",))
def up_forward(x1, x2, params, *, tile_lanes=2048):
    """Up.forward(x1, x2) — x1, x2 in NCHW float32; returns NCHW float32."""
    w1, w2, g1, b1, g2, b2 = params
    N, C1, H1, W1s = x1.shape
    Nb, C2, H2, W2s = x2.shape
    assert N == Nb
    Cmid, Cin = w1.shape[0], w1.shape[1]
    Cout = w2.shape[0]
    assert Cin == C1 + C2

    # Separable bilinear upsample (align_corners=True) + F.pad as two tiny
    # matmuls in the wrapper; default precision (exact weights, loose tol).
    diffY = H2 - 2 * H1
    diffX = W2s - 2 * W1s
    wh = jnp.asarray(_bilinear_matrix(H1, 2 * H1, diffY // 2, diffY - diffY // 2))
    ww = jnp.asarray(_bilinear_matrix(W1s, 2 * W1s, diffX // 2, diffX - diffX // 2))
    x1up = jnp.einsum('ph,qw,nchw->ncpq', wh, ww, x1)
    x = jnp.concatenate([x2, x1up], axis=1)                 # (N, Cin, H2, W2)

    # Zero-bordered channel-major slab: lane = flattened (n, h+1, w+1) over
    # (H2+2, W2+2) padded images -> conv taps never need per-tap masks.
    Hp, Wp = H2 + 2, W2s + 2
    L = N * Hp * Wp
    n_valid = N * H2 * W2s

    cin_p = _round_up(Cin, 8)
    cmid_p = _round_up(Cmid, 8)
    cout_p = _round_up(Cout, 8)

    vmem_limit = _vmem_limit_bytes()
    PAD, TL, L_pad, _ = _pick_tiling(L, Wp, max(cin_p, cmid_p),
                                     max(cmid_p, cout_p), tile_lanes, vmem_limit)

    xp4 = jnp.pad(x, ((0, 0), (0, 0), (1, 1), (1, 1)))
    x2d = jnp.transpose(xp4, (1, 0, 2, 3)).reshape(Cin, L)
    x2d = jnp.pad(x2d, ((0, cin_p - Cin), (0, L_pad - L))).astype(jnp.bfloat16)

    # Interior-pixel mask over the padded lane layout (compile-time constant).
    mimg = np.zeros((Hp, Wp), np.float32)
    mimg[1:-1, 1:-1] = 1.0
    mnp = np.zeros((1, L_pad), np.float32)
    mnp[0, :L] = np.tile(mimg.reshape(-1), N)
    mask = jnp.asarray(mnp)

    # Conv weights stacked tap-major: column = ((dy+1)*3+(dx+1))*Cin_p + c,
    # with zero-padded channels so all MXU operands are 8-row aligned.
    def stack_w(w, co_p, ci_p):
        co, ci = w.shape[:2]
        wpad = jnp.pad(w, ((0, co_p - co), (0, ci_p - ci), (0, 0), (0, 0)))
        return jnp.transpose(wpad, (0, 2, 3, 1)).reshape(co_p, 9 * ci_p)

    w1s = stack_w(w1, cmid_p, cin_p)
    w2s = stack_w(w2, cout_p, cmid_p)
    g1p = jnp.pad(g1, ((0, cmid_p - Cmid), (0, 0)))
    b1p = jnp.pad(b1, ((0, cmid_p - Cmid), (0, 0)))

    # Pass 1: conv1 + partial BN stats (y1 kept bf16 in HBM).
    y1, m1, v1 = _conv_pass(x2d, mask, w1s, Wp, n_valid, TL, PAD, vmem_limit,
                            jnp.bfloat16)
    sc1 = g1p * jax.lax.rsqrt(v1 + BN_EPS)
    sh1 = b1p - m1 * sc1
    # Pass 2: folded BN1 + LeakyReLU + conv2 + partial BN stats.
    y2, m2, v2 = _conv_pass(y1, mask, w2s, Wp, n_valid, TL, PAD, vmem_limit,
                            jnp.float32, scale=sc1, shift=sh1)
    # BN2 + LeakyReLU fused into the XLA epilogue (slice/reshape/transpose).
    sc2 = g2 * jax.lax.rsqrt(v2[:Cout] + BN_EPS)
    sh2 = b2 - m2[:Cout] * sc2
    z = y2[:Cout, :L] * sc2 + sh2
    z = jnp.where(z > 0, z, LEAKY_SLOPE * z)
    out = z.reshape(Cout, N, Hp, Wp)[:, :, 1:-1, 1:-1]
    return jnp.transpose(out, (1, 0, 2, 3))


def init_params(key, in_channels, out_channels):
    mid = in_channels // 2    # DoubleConv(in, out, mid=in//2) in bilinear mode
    k1, k2 = jax.random.split(key)
    w1 = jax.random.normal(k1, (mid, in_channels, 3, 3), jnp.float32) * 0.1
    w2 = jax.random.normal(k2, (out_channels, mid, 3, 3), jnp.float32) * 0.1
    g1 = jnp.ones((mid, 1), jnp.float32)
    b1 = jnp.zeros((mid, 1), jnp.float32)
    g2 = jnp.ones((out_channels, 1), jnp.float32)
    b2 = jnp.zeros((out_channels, 1), jnp.float32)
    return w1, w2, g1, b1, g2, b2


def reference(x1, x2, w1, w2, g1, b1, g2, b2):
    """Pure-JAX (XLA) reference of Up.forward for the numerical check."""
    N, C1, H1, W1s = x1.shape
    _, C2, H2, W2s = x2.shape
    diffY = H2 - 2 * H1
    diffX = W2s - 2 * W1s
    wh = jnp.asarray(_bilinear_matrix(H1, 2 * H1, diffY // 2, diffY - diffY // 2))
    ww = jnp.asarray(_bilinear_matrix(W1s, 2 * W1s, diffX // 2, diffX - diffX // 2))
    x1u = jnp.einsum('ph,qw,nchw->ncpq', wh, ww, x1,
                     precision=jax.lax.Precision.HIGHEST)
    x = jnp.concatenate([x2, x1u], axis=1)

    def conv_bn_lrelu(x, w, g, b):
        y = jax.lax.conv_general_dilated(
            x, w, (1, 1), ((1, 1), (1, 1)),
            dimension_numbers=('NCHW', 'OIHW', 'NCHW'),
            precision=jax.lax.Precision.HIGHEST)
        mean = y.mean(axis=(0, 2, 3), keepdims=True)
        var = ((y - mean) ** 2).mean(axis=(0, 2, 3), keepdims=True)
        yn = (y - mean) * jax.lax.rsqrt(var + BN_EPS) * g.reshape(1, -1, 1, 1) \
             + b.reshape(1, -1, 1, 1)
        return jnp.where(yn > 0, yn, LEAKY_SLOPE * yn)

    return conv_bn_lrelu(conv_bn_lrelu(x, w1, g1, b1), w2, g2, b2)


if __name__ == "__main__":
    key = jax.random.PRNGKey(0)
    kx1, kx2, kp, kx3, kx4 = jax.random.split(key, 5)

    # Up(in_channels=8, out_channels=4, bilinear=True):
    # x1 is the low-resolution feature map, x2 the skip connection.
    N, C1, H1, W1 = 2, 4, 8, 8
    C2, H2, W2 = 4, 16, 16
    in_channels, out_channels = C1 + C2, 4

    x1 = jax.random.normal(kx1, (N, C1, H1, W1), jnp.float32)
    x2 = jax.random.normal(kx2, (N, C2, H2, W2), jnp.float32)
    params = init_params(kp, in_channels, out_channels)
    ref = jax.block_until_ready(reference(x1, x2, *params))

    # Multi-tile path (128-lane tiles) — exercises the halo logic.
    out = jax.block_until_ready(up_forward(x1, x2, params, tile_lanes=128))
    assert out.shape == (N, out_channels, H2, W2)
    np.testing.assert_allclose(np.asarray(out), np.asarray(ref), rtol=2e-2, atol=2e-2)

    # Default (large-tile) path on the same inputs (grid still kept >= 2 steps).
    out_big = jax.block_until_ready(up_forward(x1, x2, params))
    np.testing.assert_allclose(np.asarray(out_big), np.asarray(ref), rtol=2e-2, atol=2e-2)

    # Case with real lane padding (1x12x12 images -> non-multiple lane count).
    x1b = jax.random.normal(kx3, (1, C1, 6, 6), jnp.float32)
    x2b = jax.random.normal(kx4, (1, C2, 12, 12), jnp.float32)
    outb = jax.block_until_ready(up_forward(x1b, x2b, params, tile_lanes=128))
    refb = jax.block_until_ready(reference(x1b, x2b, *params))
    np.testing.assert_allclose(np.asarray(outb), np.asarray(refb), rtol=2e-2, atol=2e-2)

    print("KERNEL_OK")
</pallas_src>

<mosaic_0001>
module attributes {stable_mosaic.version = 11 : i64} {
  func.func @_conv_block_kernel(%arg0: i32, %arg1: memref<8x128xbf16, #tpu.memory_space<vmem>>, %arg2: memref<8x128xbf16, #tpu.memory_space<vmem>>, %arg3: memref<8x128xbf16, #tpu.memory_space<vmem>>, %arg4: memref<1x128xf32, #tpu.memory_space<vmem>>, %arg5: memref<8x72xf32, #tpu.memory_space<vmem>>, %arg6: memref<8x128xbf16, #tpu.memory_space<vmem>>, %arg7: memref<1x16x128xf32, #tpu.memory_space<vmem>>) attributes {dimension_semantics = [#tpu.dimension_semantics<parallel>], iteration_bounds = array<i64: 6>, scalar_prefetch = 0 : i64, scratch_operands = 0 : i64, tpu.core_type = #tpu.core_type<tc>, window_params = [{transform_indices = @transform_0, window_bounds = array<i64: 8, 128>}, {transform_indices = @transform_1, window_bounds = array<i64: 8, 128>}, {transform_indices = @transform_2, window_bounds = array<i64: 8, 128>}, {transform_indices = @transform_3, window_bounds = array<i64: 1, 128>}, {pipeline_mode = #tpu.pipeline_mode<synchronous>, transform_indices = @transform_4, window_bounds = array<i64: 8, 72>}, {transform_indices = @transform_5, window_bounds = array<i64: 8, 128>}, {transform_indices = @transform_6, window_bounds = array<i64: 1, 16, 128>}]} {
    %c0 = arith.constant 0 : index
    %c0_0 = arith.constant 0 : index
    %0 = vector.load %arg1[%c0, %c0_0] : memref<8x128xbf16, #tpu.memory_space<vmem>>, vector<8x128xbf16>
    %c0_1 = arith.constant 0 : index
    %c0_2 = arith.constant 0 : index
    %1 = vector.load %arg2[%c0_1, %c0_2] : memref<8x128xbf16, #tpu.memory_space<vmem>>, vector<8x128xbf16>
    %c0_3 = arith.constant 0 : index
    %c0_4 = arith.constant 0 : index
    %2 = vector.load %arg3[%c0_3, %c0_4] : memref<8x128xbf16, #tpu.memory_space<vmem>>, vector<8x128xbf16>
    %3 = tpu.concatenate %0, %1, %2 in 1 : vector<8x128xbf16>, vector<8x128xbf16>, vector<8x128xbf16> -> vector<8x384xbf16>
    %4 = arith.extf %3 : vector<8x384xbf16> to vector<8x384xf32>
    %5 = vector.extract_strided_slice %4 {offsets = [0, 109], sizes = [8, 128], strides = [1, 1]} : vector<8x384xf32> to vector<8x128xf32>
    %6 = vector.extract_strided_slice %4 {offsets = [0, 110], sizes = [8, 128], strides = [1, 1]} : vector<8x384xf32> to vector<8x128xf32>
    %7 = vector.extract_strided_slice %4 {offsets = [0, 111], sizes = [8, 128], strides = [1, 1]} : vector<8x384xf32> to vector<8x128xf32>
    %8 = vector.extract_strided_slice %4 {offsets = [0, 127], sizes = [8, 128], strides = [1, 1]} : vector<8x384xf32> to vector<8x128xf32>
    %9 = vector.extract_strided_slice %4 {offsets = [0, 128], sizes = [8, 128], strides = [1, 1]} : vector<8x384xf32> to vector<8x128xf32>
    %10 = vector.extract_strided_slice %4 {offsets = [0, 129], sizes = [8, 128], strides = [1, 1]} : vector<8x384xf32> to vector<8x128xf32>
    %11 = vector.extract_strided_slice %4 {offsets = [0, 145], sizes = [8, 128], strides = [1, 1]} : vector<8x384xf32> to vector<8x128xf32>
    %12 = vector.extract_strided_slice %4 {offsets = [0, 146], sizes = [8, 128], strides = [1, 1]} : vector<8x384xf32> to vector<8x128xf32>
    %13 = vector.extract_strided_slice %4 {offsets = [0, 147], sizes = [8, 128], strides = [1, 1]} : vector<8x384xf32> to vector<8x128xf32>
    %14 = tpu.concatenate %5, %6, %7, %8, %9, %10, %11, %12, %13 in 0 : vector<8x128xf32>, vector<8x128xf32>, vector<8x128xf32>, vector<8x128xf32>, vector<8x128xf32>, vector<8x128xf32>, vector<8x128xf32>, vector<8x128xf32>, vector<8x128xf32> -> vector<72x128xf32>
    %c0_5 = arith.constant 0 : index
    %c0_6 = arith.constant 0 : index
    %15 = vector.load %arg5[%c0_5, %c0_6] : memref<8x72xf32, #tpu.memory_space<vmem>>, vector<8x72xf32>
    %cst = arith.constant dense<0.000000e+00> : vector<8x128xf32>
    %16 = tpu.matmul %15, %14, %cst {dimension_numbers = #tpu.dot_dimension_numbers<[1], [0], [0], [1], [0, 0, 1, 1], [], []>} : vector<8x72xf32>, vector<72x128xf32>, vector<8x128xf32> -> vector<8x128xf32>
    %c0_7 = arith.constant 0 : index
    %c0_8 = arith.constant 0 : index
    %17 = vector.load %arg4[%c0_7, %c0_8] : memref<1x128xf32, #tpu.memory_space<vmem>>, vector<1x128xf32>
    %18 = vector.broadcast %17 : vector<1x128xf32> to vector<8x128xf32>
    %19 = arith.mulf %16, %18 : vector<8x128xf32>
    %20 = arith.truncf %19 : vector<8x128xf32> to vector<8x128xbf16>
    %c0_9 = arith.constant 0 : index
    %c0_10 = arith.constant 0 : index
    %21 = vector.load %arg6[%c0_9, %c0_10] : memref<8x128xbf16, #tpu.memory_space<vmem>>, vector<8x128xbf16>
    tpu.vector_store %arg6[%c0_9, %c0_10], %20 {strides = array<i32>} : memref<8x128xbf16, #tpu.memory_space<vmem>>, vector<8x128xbf16>,
    %cst_11 = arith.constant dense<0.000000e+00> : vector<8xf32>
    %22 = vector.multi_reduction <add>, %19, %cst_11 [1] : vector<8x128xf32> to vector<8xf32>
    %23 = vector.shape_cast %22 : vector<8xf32> to vector<8x1xf32>
    %24 = arith.mulf %19, %19 : vector<8x128xf32>
    %cst_12 = arith.constant dense<0.000000e+00> : vector<8xf32>
    %25 = vector.multi_reduction <add>, %24, %cst_12 [1] : vector<8x128xf32> to vector<8xf32>
    %26 = vector.shape_cast %25 : vector<8xf32> to vector<8x1xf32>
    %27 = tpu.concatenate %23, %26 in 0 : vector<8x1xf32>, vector<8x1xf32> -> vector<16x1xf32>
    %28 = vector.shape_cast %27 : vector<16x1xf32> to vector<16x1xf32>
    %29 = vector.broadcast %28 : vector<16x1xf32> to vector<16x128xf32>
    %30 = vector.shape_cast %29 : vector<16x128xf32> to vector<1x16x128xf32>
    %c0_13 = arith.constant 0 : index
    %c0_14 = arith.constant 0 : index
    %c0_15 = arith.constant 0 : index
    %31 = vector.load %arg7[%c0_13, %c0_14, %c0_15] : memref<1x16x128xf32, #tpu.memory_space<vmem>>, vector<1x16x128xf32>
    tpu.vector_store %arg7[%c0_13, %c0_14, %c0_15], %30 {strides = array<i32>} : memref<1x16x128xf32, #tpu.memory_space<vmem>>, vector<1x16x128xf32>,
    return
  }
  func.func @transform_0(%arg0: i32) -> (i32, i32) {
    %c1_i32 = arith.constant 1 : i32
    %0 = arith.muli %arg0, %c1_i32 : i32
    %c1_i32_0 = arith.constant 1 : i32
    %1 = arith.subi %0, %c1_i32_0 : i32
    %c0_i32 = arith.constant 0 : i32
    %2 = arith.maxsi %1, %c0_i32 : i32
    %c0_i32_1 = arith.constant 0 : i32
    %c0_i32_2 = arith.constant 0 : i32
    return %c0_i32_1, %2 : i32, i32
  }
  func.func @transform_1(%arg0: i32) -> (i32, i32) {
    %c0_i32 = arith.constant 0 : i32
    %c0_i32_0 = arith.constant 0 : i32
    return %c0_i32, %arg0 : i32, i32
  }
  func.func @transform_2(%arg0: i32) -> (i32, i32) {
    %c1_i32 = arith.constant 1 : i32
    %0 = arith.addi %arg0, %c1_i32 : i32
    %c1_i32_0 = arith.constant 1 : i32
    %1 = arith.muli %0, %c1_i32_0 : i32
    %c5_i32 = arith.constant 5 : i32
    %2 = arith.minsi %1, %c5_i32 : i32
    %c0_i32 = arith.constant 0 : i32
    %c0_i32_1 = arith.constant 0 : i32
    return %c0_i32, %2 : i32, i32
  }
  func.func @transform_3(%arg0: i32) -> (i32, i32) {
    %c0_i32 = arith.constant 0 : i32
    %c0_i32_0 = arith.constant 0 : i32
    return %c0_i32, %arg0 : i32, i32
  }
  func.func @transform_4(%arg0: i32) -> (i32, i32) {
    %c0_i32 = arith.constant 0 : i32
    %c0_i32_0 = arith.constant 0 : i32
    %c0_i32_1 = arith.constant 0 : i32
    return %c0_i32, %c0_i32_0 : i32, i32
  }
  func.func @transform_5(%arg0: i32) -> (i32, i32) {
    %c0_i32 = arith.constant 0 : i32
    %c0_i32_0 = arith.constant 0 : i32
    return %c0_i32, %arg0 : i32, i32
  }
  func.func @transform_6(%arg0: i32) -> (i32, i32, i32) {
    %c0_i32 = arith.constant 0 : i32
    %c0_i32_0 = arith.constant 0 : i32
    %c0_i32_1 = arith.constant 0 : i32
    return %arg0, %c0_i32, %c0_i32_0 : i32, i32, i32
  }
}

module attributes {stable_mosaic.version = 11 : i64} {
  func.func @_conv_block_kernel(%arg0: i32, %arg1: memref<8x128xbf16, #tpu.memory_space<vmem>>, %arg2: memref<8x128xbf16, #tpu.memory_space<vmem>>, %arg3: memref<8x128xbf16, #tpu.memory_space<vmem>>, %arg4: memref<1x128xf32, #tpu.memory_space<vmem>>, %arg5: memref<1x128xf32, #tpu.memory_space<vmem>>, %arg6: memref<1x128xf32, #tpu.memory_space<vmem>>, %arg7: memref<8x1xf32, #tpu.memory_space<vmem>>, %arg8: memref<8x1xf32, #tpu.memory_space<vmem>>, %arg9: memref<8x72xf32, #tpu.memory_space<vmem>>, %arg10: memref<8x128xf32, #tpu.memory_space<vmem>>, %arg11: memref<1x16x128xf32, #tpu.memory_space<vmem>>) attributes {dimension_semantics = [#tpu.dimension_semantics<parallel>], iteration_bounds = array<i64: 6>, scalar_prefetch = 0 : i64, scratch_operands = 0 : i64, tpu.core_type = #tpu.core_type<tc>, window_params = [{transform_indices = @transform_0, window_bounds = array<i64: 8, 128>}, {transform_indices = @transform_1, window_bounds = array<i64: 8, 128>}, {transform_indices = @transform_2, window_bounds = array<i64: 8, 128>}, {transform_indices = @transform_3, window_bounds = array<i64: 1, 128>}, {transform_indices = @transform_4, window_bounds = array<i64: 1, 128>}, {transform_indices = @transform_5, window_bounds = array<i64: 1, 128>}, {pipeline_mode = #tpu.pipeline_mode<synchronous>, transform_indices = @transform_6, window_bounds = array<i64: 8, 1>}, {pipeline_mode = #tpu.pipeline_mode<synchronous>, transform_indices = @transform_7, window_bounds = array<i64: 8, 1>}, {pipeline_mode = #tpu.pipeline_mode<synchronous>, transform_indices = @transform_8, window_bounds = array<i64: 8, 72>}, {transform_indices = @transform_9, window_bounds = array<i64: 8, 128>}, {transform_indices = @transform_10, window_bounds = array<i64: 1, 16, 128>}]} {
    %c0 = arith.constant 0 : index
    %c0_0 = arith.constant 0 : index
    %0 = vector.load %arg1[%c0, %c0_0] : memref<8x128xbf16, #tpu.memory_space<vmem>>, vector<8x128xbf16>
    %c0_1 = arith.constant 0 : index
    %c0_2 = arith.constant 0 : index
    %1 = vector.load %arg2[%c0_1, %c0_2] : memref<8x128xbf16, #tpu.memory_space<vmem>>, vector<8x128xbf16>
    %c0_3 = arith.constant 0 : index
    %c0_4 = arith.constant 0 : index
    %2 = vector.load %arg3[%c0_3, %c0_4] : memref<8x128xbf16, #tpu.memory_space<vmem>>, vector<8x128xbf16>
    %3 = tpu.concatenate %0, %1, %2 in 1 : vector<8x128xbf16>, vector<8x128xbf16>, vector<8x128xbf16> -> vector<8x384xbf16>
    %4 = arith.extf %3 : vector<8x384xbf16> to vector<8x384xf32>
    %c0_5 = arith.constant 0 : index
    %c0_6 = arith.constant 0 : index
    %5 = vector.load %arg4[%c0_5, %c0_6] : memref<1x128xf32, #tpu.memory_space<vmem>>, vector<1x128xf32>
    %c0_7 = arith.constant 0 : index
    %c0_8 = arith.constant 0 : index
    %6 = vector.load %arg5[%c0_7, %c0_8] : memref<1x128xf32, #tpu.memory_space<vmem>>, vector<1x128xf32>
    %c0_9 = arith.constant 0 : index
    %c0_10 = arith.constant 0 : index
    %7 = vector.load %arg6[%c0_9, %c0_10] : memref<1x128xf32, #tpu.memory_space<vmem>>, vector<1x128xf32>
    %8 = tpu.concatenate %5, %6, %7 in 1 : vector<1x128xf32>, vector<1x128xf32>, vector<1x128xf32> -> vector<1x384xf32>
    %c0_11 = arith.constant 0 : index
    %c0_12 = arith.constant 0 : index
    %9 = vector.load %arg7[%c0_11, %c0_12] : memref<8x1xf32, #tpu.memory_space<vmem>>, vector<8x1xf32>
    %10 = vector.broadcast %9 : vector<8x1xf32> to vector<8x384xf32>
    %11 = arith.mulf %4, %10 : vector<8x384xf32>
    %c0_13 = arith.constant 0 : index
    %c0_14 = arith.constant 0 : index
    %12 = vector.load %arg8[%c0_13, %c0_14] : memref<8x1xf32, #tpu.memory_space<vmem>>, vector<8x1xf32>
    %13 = vector.broadcast %12 : vector<8x1xf32> to vector<8x384xf32>
    %14 = arith.addf %11, %13 : vector<8x384xf32>
    %cst = arith.constant 0.000000e+00 : f32
    %15 = vector.broadcast %cst : f32 to vector<8x384xf32>
    %16 = arith.cmpf ogt, %14, %15 : vector<8x384xf32>
    %cst_15 = arith.constant 0.00999999977 : f32
    %17 = vector.broadcast %cst_15 : f32 to vector<8x384xf32>
    %18 = arith.mulf %17, %14 : vector<8x384xf32>
    %19 = arith.select %16, %14, %18 : vector<8x384xi1>, vector<8x384xf32>
    %20 = vector.broadcast %8 : vector<1x384xf32> to vector<8x384xf32>
    %21 = arith.mulf %19, %20 : vector<8x384xf32>
    %22 = vector.extract_strided_slice %21 {offsets = [0, 109], sizes = [8, 128], strides = [1, 1]} : vector<8x384xf32> to vector<8x128xf32>
    %23 = vector.extract_strided_slice %21 {offsets = [0, 110], sizes = [8, 128], strides = [1, 1]} : vector<8x384xf32> to vector<8x128xf32>
    %24 = vector.extract_strided_slice %21 {offsets = [0, 111], sizes = [8, 128], strides = [1, 1]} : vector<8x384xf32> to vector<8x128xf32>
    %25 = vector.extract_strided_slice %21 {offsets = [0, 127], sizes = [8, 128], strides = [1, 1]} : vector<8x384xf32> to vector<8x128xf32>
    %26 = vector.extract_strided_slice %21 {offsets = [0, 128], sizes = [8, 128], strides = [1, 1]} : vector<8x384xf32> to vector<8x128xf32>
    %27 = vector.extract_strided_slice %21 {offsets = [0, 129], sizes = [8, 128], strides = [1, 1]} : vector<8x384xf32> to vector<8x128xf32>
    %28 = vector.extract_strided_slice %21 {offsets = [0, 145], sizes = [8, 128], strides = [1, 1]} : vector<8x384xf32> to vector<8x128xf32>
    %29 = vector.extract_strided_slice %21 {offsets = [0, 146], sizes = [8, 128], strides = [1, 1]} : vector<8x384xf32> to vector<8x128xf32>
    %30 = vector.extract_strided_slice %21 {offsets = [0, 147], sizes = [8, 128], strides = [1, 1]} : vector<8x384xf32> to vector<8x128xf32>
    %31 = tpu.concatenate %22, %23, %24, %25, %26, %27, %28, %29, %30 in 0 : vector<8x128xf32>, vector<8x128xf32>, vector<8x128xf32>, vector<8x128xf32>, vector<8x128xf32>, vector<8x128xf32>, vector<8x128xf32>, vector<8x128xf32>, vector<8x128xf32> -> vector<72x128xf32>
    %c0_16 = arith.constant 0 : index
    %c0_17 = arith.constant 0 : index
    %32 = vector.load %arg9[%c0_16, %c0_17] : memref<8x72xf32, #tpu.memory_space<vmem>>, vector<8x72xf32>
    %cst_18 = arith.constant dense<0.000000e+00> : vector<8x128xf32>
    %33 = tpu.matmul %32, %31, %cst_18 {dimension_numbers = #tpu.dot_dimension_numbers<[1], [0], [0], [1], [0, 0, 1, 1], [], []>} : vector<8x72xf32>, vector<72x128xf32>, vector<8x128xf32> -> vector<8x128xf32>
    %c0_19 = arith.constant 0 : index
    %c0_20 = arith.constant 0 : index
    %34 = vector.load %arg5[%c0_19, %c0_20] : memref<1x128xf32, #tpu.memory_space<vmem>>, vector<1x128xf32>
    %35 = vector.broadcast %34 : vector<1x128xf32> to vector<8x128xf32>
    %36 = arith.mulf %33, %35 : vector<8x128xf32>
    %c0_21 = arith.constant 0 : index
    %c0_22 = arith.constant 0 : index
    %37 = vector.load %arg10[%c0_21, %c0_22] : memref<8x128xf32, #tpu.memory_space<vmem>>, vector<8x128xf32>
    tpu.vector_store %arg10[%c0_21, %c0_22], %36 {strides = array<i32>} : memref<8x128xf32, #tpu.memory_space<vmem>>, vector<8x128xf32>,
    %cst_23 = arith.constant dense<0.000000e+00> : vector<8xf32>
    %38 = vector.multi_reduction <add>, %36, %cst_23 [1] : vector<8x128xf32> to vector<8xf32>
    %39 = vector.shape_cast %38 : vector<8xf32> to vector<8x1xf32>
    %40 = arith.mulf %36, %36 : vector<8x128xf32>
    %cst_24 = arith.constant dense<0.000000e+00> : vector<8xf32>
    %41 = vector.multi_reduction <add>, %40, %cst_24 [1] : vector<8x128xf32> to vector<8xf32>
    %42 = vector.shape_cast %41 : vector<8xf32> to vector<8x1xf32>
    %43 = tpu.concatenate %39, %42 in 0 : vector<8x1xf32>, vector<8x1xf32> -> vector<16x1xf32>
    %44 = vector.shape_cast %43 : vector<16x1xf32> to vector<16x1xf32>
    %45 = vector.broadcast %44 : vector<16x1xf32> to vector<16x128xf32>
    %46 = vector.shape_cast %45 : vector<16x128xf32> to vector<1x16x128xf32>
    %c0_25 = arith.constant 0 : index
    %c0_26 = arith.constant 0 : index
    %c0_27 = arith.constant 0 : index
    %47 = vector.load %arg11[%c0_25, %c0_26, %c0_27] : memref<1x16x128xf32, #tpu.memory_space<vmem>>, vector<1x16x128xf32>
    tpu.vector_store %arg11[%c0_25, %c0_26, %c0_27], %46 {strides = array<i32>} : memref<1x16x128xf32, #tpu.memory_space<vmem>>, vector<1x16x128xf32>,
    return
  }
  func.func @transform_0(%arg0: i32) -> (i32, i32) {
    %c1_i32 = arith.constant 1 : i32
    %0 = arith.muli %arg0, %c1_i32 : i32
    %c1_i32_0 = arith.constant 1 : i32
    %1 = arith.subi %0, %c1_i32_0 : i32
    %c0_i32 = arith.constant 0 : i32
    %2 = arith.maxsi %1, %c0_i32 : i32
    %c0_i32_1 = arith.constant 0 : i32
    %c0_i32_2 = arith.constant 0 : i32
    return %c0_i32_1, %2 : i32, i32
  }
  func.func @transform_1(%arg0: i32) -> (i32, i32) {
    %c0_i32 = arith.constant 0 : i32
    %c0_i32_0 = arith.constant 0 : i32
    return %c0_i32, %arg0 : i32, i32
  }
  func.func @transform_2(%arg0: i32) -> (i32, i32) {
    %c1_i32 = arith.constant 1 : i32
    %0 = arith.addi %arg0, %c1_i32 : i32
    %c1_i32_0 = arith.constant 1 : i32
    %1 = arith.muli %0, %c1_i32_0 : i32
    %c5_i32 = arith.constant 5 : i32
    %2 = arith.minsi %1, %c5_i32 : i32
    %c0_i32 = arith.constant 0 : i32
    %c0_i32_1 = arith.constant 0 : i32
    return %c0_i32, %2 : i32, i32
  }
  func.func @transform_3(%arg0: i32) -> (i32, i32) {
    %c1_i32 = arith.constant 1 : i32
    %0 = arith.muli %arg0, %c1_i32 : i32
    %c1_i32_0 = arith.constant 1 : i32
    %1 = arith.subi %0, %c1_i32_0 : i32
    %c0_i32 = arith.constant 0 : i32
    %2 = arith.maxsi %1, %c0_i32 : i32
    %c0_i32_1 = arith.constant 0 : i32
    %c0_i32_2 = arith.constant 0 : i32
    return %c0_i32_1, %2 : i32, i32
  }
  func.func @transform_4(%arg0: i32) -> (i32, i32) {
    %c0_i32 = arith.constant 0 : i32
    %c0_i32_0 = arith.constant 0 : i32
    return %c0_i32, %arg0 : i32, i32
  }
  func.func @transform_5(%arg0: i32) -> (i32, i32) {
    %c1_i32 = arith.constant 1 : i32
    %0 = arith.addi %arg0, %c1_i32 : i32
    %c1_i32_0 = arith.constant 1 : i32
    %1 = arith.muli %0, %c1_i32_0 : i32
    %c5_i32 = arith.constant 5 : i32
    %2 = arith.minsi %1, %c5_i32 : i32
    %c0_i32 = arith.constant 0 : i32
    %c0_i32_1 = arith.constant 0 : i32
    return %c0_i32, %2 : i32, i32
  }
  func.func @transform_6(%arg0: i32) -> (i32, i32) {
    %c0_i32 = arith.constant 0 : i32
    %c0_i32_0 = arith.constant 0 : i32
    %c0_i32_1 = arith.constant 0 : i32
    return %c0_i32, %c0_i32_0 : i32, i32
  }
  func.func @transform_7(%arg0: i32) -> (i32, i32) {
    %c0_i32 = arith.constant 0 : i32
    %c0_i32_0 = arith.constant 0 : i32
    %c0_i32_1 = arith.constant 0 : i32
    return %c0_i32, %c0_i32_0 : i32, i32
  }
  func.func @transform_8(%arg0: i32) -> (i32, i32) {
    %c0_i32 = arith.constant 0 : i32
    %c0_i32_0 = arith.constant 0 : i32
    %c0_i32_1 = arith.constant 0 : i32
    return %c0_i32, %c0_i32_0 : i32, i32
  }
  func.func @transform_9(%arg0: i32) -> (i32, i32) {
    %c0_i32 = arith.constant 0 : i32
    %c0_i32_0 = arith.constant 0 : i32
    return %c0_i32, %arg0 : i32, i32
  }
  func.func @transform_10(%arg0: i32) -> (i32, i32, i32) {
    %c0_i32 = arith.constant 0 : i32
    %c0_i32_0 = arith.constant 0 : i32
    %c0_i32_1 = arith.constant 0 : i32
    return %arg0, %c0_i32, %c0_i32_0 : i32, i32, i32
  }
}

</mosaic_0001>

<bundles_post_ra>
// kernel: up_forward.2
= control target key start
LH: loop header
LB: loop body
LE: loop exit
PB: predicated region body
PF: predicated region fallthrough
CT: control target
= control target key end

     0   :  { %s800_s21 = smov 0   ;;  %s876_s0 = inlined_call_operand.vmem [shape: bf16[8,768], index: 0, kind: input, shape index: {}, may-alias: {0,1,2}]   ;;  %s877_s1 = inlined_call_operand.vmem [shape: bf16[8,768], index: 1, kind: input, shape index: {}, may-alias: {0,1,2}]   ;;  %s878_s2 = inlined_call_operand.vmem [shape: bf16[8,768], index: 2, kind: input, shape index: {}, may-alias: {0,1,2}]   ;;  %s879_s3 = inlined_call_operand.vmem [shape: f32[1,768], index: 3, kind: input, shape index: {}]   ;;  %s880_s4 = inlined_call_operand.vmem [shape: f32[8,72], index: 4, kind: input, shape index: {}]   ;;  %s881_s5 = inlined_call_operand.vmem [shape: bf16[8,768], index: 5, kind: output, shape index: {0}]   ;;  %s882_s6 = inlined_call_operand.vmem [shape: f32[6,16,128], index: 6, kind: output, shape index: {1}]  }
   0x1 LB: > { %s623_s22 = sadd.s32 4294967295, %s753_s21   ;;  %p629_p0 = scmp.ge.s32.totalorder %s753_s21, 1  ;;  %s753_s21 = sphi %s800_s21, %s17_s21  }
   0x2   : > { %p264_p1 = scmp.lt.s32.totalorder %s753_s21, 7 }
   0x4   : > { %p265_p2 = pnand %p629_p0, %p264_p1 }
   0x5   : > { %p324_p3 = scmp.lt.s32.totalorder (!%p265_p2), %s623_s22, 5  ;;  %s328_s23 = sadd.s32 (!%p265_p2), 1, %s623_s22 }
   0x6   : > { %268 = sbr.rel (%p265_p2) target bundleno = 654 (0x28e), region = 40  ;;  %p329_p4 = scmp.lt.s32.totalorder (!%p265_p2), %s328_s23, 5 }
   0x7   : > { %s630_s29 = sadd.s32 (!%p265_p2), 4294967295, %s623_s22  ;;  %s755_s11 = smov (!%p265_p2), 90  }
   0x8   : > { %p315_p5 = scmp.gt.s32.totalorder (!%p265_p2), %s630_s29, 0  ;;  %p631_p6 = scmp.lt.s32.totalorder (!%p265_p2), %s630_s29, 5 }
   0x9   : > { %s756_s12 = smov (!%p265_p2), 92   ;;  %s757_s16 = smov (!%p265_p2), 110  }
   0xa   : > { %s758_s17 = smov (!%p265_p2), 91   ;;  %s759_s18 = smov (!%p265_p2), 108  }
   0xb   : > { %s808_s24 = scalar_select %p324_p3, %s623_s22, 5  ;;  %vm401_vm0 = vcmask 736256   ;;  %vm389_vm1 = vcmask 752640   ;;  %vm395_vm2 = vcmask 744448   ;;  %vm383_vm3 = vcmask 883712  }
   0xc   : > { %s884_s23 = smov (!%p329_p4, %s328_s23), 5  ;;  %s888_s29 = smov (!%p315_p5, %s630_s29), 0  ;;  %vm374_vm4 = vcmask 900096   ;;  %vm368_vm5 = vcmask 1031168   ;;  %vm362_vm6 = vcmask 1039360   ;;  %vm438_vm7 = vcmask 154624  }
   0xd   : > { %s637_s25 = sshll.u32 %s808_s24, 2  ;;  %s886_s23 = smov (!%p329_p4, %s884_s23), 5  ;;  %vm456_vm8 = vcmask 588800  }
   0xe   : > { %s327_s28 = scalar_lea.vmem %s877_s1, %s637_s25  ;;  %s641_s30 = sshll.u32 %s886_s23, 2 }
   0xf   : > { %v351_v0 = vld [vmem:[%s327_s28] sm:$0xf]  ;;  %s334_s9 = scalar_lea.vmem %s878_s2, %s641_s30  ;;  %s890_s29 = smov (!%p631_p6, %s888_s29), 5 }
  0x10   : > { %v819_v1 = vunpack.c.l.bf16 %v351_v0  ;;  %v352_v2 = vld [vmem:[%s334_s9] sm:$0xf]  ;;  %s636_s10 = sshll.u32 %s890_s29, 2  ;;  %s760_s19 = smov 109  }
  0x11   : > { %v355_v3 = vunpack.c.l.bf16 %v352_v2  ;;  %s320_s15 = scalar_lea.vmem %s876_s0, %s636_s10  ;;  %s761_s20 = smov 126  }
  0x12   : > { %v825_v5 = vld [vmem:[%s320_s15] sm:$0xf]  ;;  %s762_s22 = smov 127   ;;  %s763_s23 = smov 19  }
  0x13   : > { %v669_v4 = vpack.i.bf16 %v355_v3, %v819_v1  ;;  %v353_v6 = vunpack.c.l.bf16 %v825_v5  ;;  %s340_s28 = scalar_lea.vmem %s879_s3, %s808_s24 }
  0x15   : > { %670 = vrot.lane.b32.xlu0 %v669_v4, %s755_s11  ;;  %680 = vrot.lane.b32.xlu1 %v669_v4, %s756_s12  ;;  %v689_v7 = vpack.i.bf16 %v819_v1, %v353_v6  ;;  %s344_s11 = scalar_lea.vmem %s881_s5, %s637_s25  ;;  %s650_s12 = sshll.u32 %s808_s24, 4 }
  0x16   : > { %s349_s15 = scalar_lea.vmem %s882_s6, %s650_s12 }
  0x17   : > { %690 = vrot.lane.b32.xlu2 %v689_v7, %s757_s16 }
  0x1d   : > { %675 = vrot.lane.b32.xlu0 %v669_v4, %s758_s17  ;;  %685 = vrot.lane.b32.xlu1 %v669_v4, %s759_s18 }
  0x1f   : > { %376 = vrot.lane.b32.xlu2 %v819_v1, %s760_s19 }
  0x25   : > { %695 = vrot.lane.b32.xlu0 %v689_v7, %s761_s20  ;;  %700 = vrot.lane.b32.xlu1 %v689_v7, %s762_s22 }
  0x71   : > { %v691_v18 = vpop.permute.xlu2 %690 }
  0x72   : > { %v693_v27 = vunpack.i.h.bf16 %v691_v18  ;;  %v692_v28 = vunpack.i.l.bf16 %v691_v18 }
  0x74   : > { %v375_v31 = vsel %vm374_vm4, %v692_v28, %v693_v27 }
  0x79   : > { %v377_v34 = vpop.permute.xlu2 %376 }
  0x7a   : > { %v724_v41 = vpack.i.bf16 %v375_v31, %v377_v34 }
  0x87   : > { %v671_v8 = vpop.permute.xlu0 %670  ;;  %v681_v9 = vpop.permute.xlu1 %680 }
  0x88   : > { %v673_v10 = vunpack.i.h.bf16 %v671_v8  ;;  %v672_v11 = vunpack.i.l.bf16 %v671_v8  ;;  %v683_v12 = vunpack.i.h.bf16 %v681_v9  ;;  %v682_v13 = vunpack.i.l.bf16 %v681_v9 }
  0x8a   : > { %v402_v14 = vsel %vm401_vm0, %v672_v11, %v673_v10  ;;  %v390_v15 = vsel %vm389_vm1, %v682_v13, %v683_v12 }
  0x8b   : > { %v704_v16 = vpack.i.bf16 %v402_v14, %v672_v11  ;;  %v714_v17 = vpack.i.bf16 %v390_v15, %v682_v13  ;;  %v403_v13 = vld [vmem:[%s880_s4] sm:$0xff]  ;;  %v764_v15 = vmov 0  }
  0x8c   : > { %744 = vset.pattern.permute.xlu1 %v764_v15  ;;  %745 = vset.pattern.permute.xlu0 %v764_v15 }
  0x8d   : > { %705 = vrot.lane.b32.xlu2 %v704_v16, %s763_s23  ;;  %715 = vrot.lane.b32.xlu1 %v714_v17, %s763_s23  ;;  %v746_v16 = vld [vmem:[%s340_s28] ss:$0 sm:$0xff] }
  0x8f   : > { %v676_v19 = vpop.permute.xlu0 %675  ;;  %v686_v20 = vpop.permute.xlu1 %685 }
  0x90   : > { %v678_v21 = vunpack.i.h.bf16 %v676_v19  ;;  %v677_v22 = vunpack.i.l.bf16 %v676_v19  ;;  %v688_v23 = vunpack.i.h.bf16 %v686_v20  ;;  %v687_v24 = vunpack.i.l.bf16 %v686_v20 }
  0x92   : > { %v396_v25 = vsel %vm395_vm2, %v677_v22, %v678_v21  ;;  %v384_v26 = vsel %vm383_vm3, %v687_v24, %v688_v23 }
  0x93   : > { %v709_v29 = vpack.i.bf16 %v396_v25, %v677_v22  ;;  %v719_v30 = vpack.i.bf16 %v384_v26, %v687_v24 }
  0x95   : > { %710 = vrot.lane.b32.xlu0 %v709_v29, %s763_s23  ;;  %720 = vrot.lane.b32.xlu2 %v719_v30, %s763_s23 }
  0x97   : > { %v696_v32 = vpop.permute.xlu0 %695  ;;  %v701_v33 = vpop.permute.xlu1 %700 }
  0x98   : > { %v698_v35 = vunpack.i.h.bf16 %v696_v32  ;;  %v697_v36 = vunpack.i.l.bf16 %v696_v32  ;;  %v703_v37 = vunpack.i.h.bf16 %v701_v33  ;;  %v702_v38 = vunpack.i.l.bf16 %v701_v33 }
  0x9a   : > { %v369_v39 = vsel %vm368_vm5, %v697_v36, %v698_v35  ;;  %v363_v40 = vsel %vm362_vm6, %v702_v38, %v703_v37  ;;  %v739_v44 = vpack.i.bf16 %v353_v6, %v703_v37 }
  0x9b   : > { %v729_v42 = vpack.i.bf16 %v369_v39, %v693_v27  ;;  %v734_v43 = vpack.i.bf16 %v363_v40, %v698_v35 }
  0x9d   : > { %730 = vrot.lane.b32.xlu1 %v729_v42, %s763_s23  ;;  %725 = vrot.lane.b32.xlu0 %v724_v41, %s763_s23 }
  0x9e   : > { %735 = vrot.lane.b32.xlu2 %v734_v43, %s763_s23 }
  0xa5   : > { %740 = vrot.lane.b32.xlu0 %v739_v44, %s763_s23  ;;  %406 = vrot.lane.b32.xlu1 %v819_v1, %s763_s23 }
  0xe7   : > { %v706_v45 = vpop.permute.xlu2 %705 }
  0xe8   : > { %v708_v46 = vunpack.i.h.bf16 %v706_v45  ;;  %v707_v47 = vunpack.i.l.bf16 %v706_v45 }
  0xea   : > { %v446_v48 = vsel %vm438_vm7, %v707_v47, %v708_v46 }
  0xeb   : > { %467 = vmatpush.msra.mxu0 %v446_v48 }
  0xef   : > { %v721_v50 = vpop.permute.xlu2 %720 }
  0xf0   : > { %v723_v56 = vunpack.i.h.bf16 %v721_v50  ;;  %v722_v57 = vunpack.i.l.bf16 %v721_v50 }
  0xf2   : > { %v443_v60 = vsel %vm438_vm7, %v722_v57, %v723_v56 }
  0xf8   : > { %v736_v63 = vpop.permute.xlu2 %735 }
  0xf9   : > { %v737_v5 = vunpack.i.l.bf16 %v736_v63  ;;  %v738_v8 = vunpack.i.h.bf16 %v736_v63 }
  0xff   : > { %v716_v49 = vpop.permute.xlu1 %715 }
 0x100   : > { %v718_v52 = vunpack.i.h.bf16 %v716_v49  ;;  %v717_v53 = vunpack.i.l.bf16 %v716_v49 }
 0x102   : > { %v444_v59 = vsel %vm438_vm7, %v717_v53, %v718_v52 }
 0x107   : > { %v711_v51 = vpop.permute.xlu0 %710 }
 0x108   : > { %v713_v54 = vunpack.i.h.bf16 %v711_v51  ;;  %v712_v55 = vunpack.i.l.bf16 %v711_v51 }
 0x10a   : > { %v445_v58 = vsel %vm438_vm7, %v712_v55, %v713_v54 }
 0x10b   : > { %468 = vmatpush.msra.mxu0 %v445_v58 }
 0x10d   : > { %469 = vmatpush.msra.mxu0 %v444_v59 }
 0x10f   : > { %470 = vmatpush.msra.mxu0 %v443_v60  ;;  %v731_v61 = vpop.permute.xlu1 %730  ;;  %v726_v62 = vpop.permute.xlu0 %725 }
 0x110   : > { %v732_v0 = vunpack.i.l.bf16 %v731_v61  ;;  %v728_v1 = vunpack.i.h.bf16 %v726_v62  ;;  %v727_v2 = vunpack.i.l.bf16 %v726_v62  ;;  %v733_v3 = vunpack.i.h.bf16 %v731_v61 }
 0x112   : > { %471 = vmatpush.msra.mxu0 %v727_v2  ;;  %v442_v4 = vsel %vm438_vm7, %v728_v1, %v732_v0  ;;  %v441_v6 = vsel %vm438_vm7, %v733_v3, %v737_v5 }
 0x114   : > { %472 = vmatpush.msra.mxu0 %v442_v4 }
 0x116   : > { %473 = vmatpush.msra.mxu0 %v441_v6 }
 0x117   : > { %v741_v7 = vpop.permute.xlu0 %740  ;;  %v407_v11 = vpop.permute.xlu1 %406 }
 0x118   : > { %v743_v9 = vunpack.i.h.bf16 %v741_v7  ;;  %v742_v10 = vunpack.i.l.bf16 %v741_v7 }
 0x11a   : > { %v440_v12 = vsel %vm438_vm7, %v738_v8, %v742_v10  ;;  %v439_v14 = vsel %vm438_vm7, %v743_v9, %v407_v11 }
 0x11b   : > { %474 = vmatpush.msra.mxu0 %v440_v12 }
 0x11d   : > { %475 = vmatpush.msra.mxu0 %v439_v14 }
 0x11e   : > { %645 = vmatmul.msk.f32.vlgmr.msra.gmra.mxu0 %vm456_vm8, %v403_v13 }
 0x19b   : > { %v477_v17 = vpop.f32.mrf.mxu0 }
 0x19c   : > { %v484_v18 = vmul.f32 %v746_v16, %v477_v17 }
 0x19e   : > { %v485_v19 = vpack.c.bf16 %v484_v18, %v484_v18  ;;  %487 = vadd.xlane.f32.xlu2 %v484_v18  ;;  %v489_v20 = vmul.f32 %v484_v18, %v484_v18 }
 0x1a0   : > { %486 = vst [vmem:[%s344_s11] sm:$0xf] %v485_v19  ;;  %490 = vadd.xlane.f32.xlu0 %v489_v20 }
 0x211   : > { %v488_v21 = vpop.xlane.xlu2 %487 }
 0x212   : > { %494 = vperm.xlu1 %744, %v488_v21  }
 0x213   : > { %v491_v22 = vpop.xlane.xlu0 %490 }
 0x21a   : > { %499 = vperm.xlu1 %744, %v491_v22  }
 0x284   : > { %v495_v23 = vpop.permute.xlu1 %494 }
 0x285   : > { %502 = vst [vmem:[%s349_s15] sm:$0xff] %v495_v23 }
 0x28c   : > { %v500_v24 = vpop.permute.xlu1 %499 }
 0x28d   : > { %503 = vst [vmem:[%s349_s15 + $0x8] sm:$0xff] %v500_v24 }
 0x28e PF: > { %s17_s21 = sadd.s32 1, %s753_s21  }
 0x28f   : > { %p14_p7 = scmp.ge.s32.totalorder %s17_s21, 8  }
 0x291   :  { %16 = sbr.rel (!%p14_p7) target bundleno = 1 (0x1), region = 91 }

// kernel: up_forward.3
= control target key start
LH: loop header
LB: loop body
LE: loop exit
PB: predicated region body
PF: predicated region fallthrough
CT: control target
= control target key end

     0   :  { %s1064_s13 = smov 0   ;;  %s1143_s0 = inlined_call_operand.vmem [shape: bf16[8,768], index: 0, kind: input, shape index: {}, may-alias: {0,1,2}]   ;;  %s1144_s1 = inlined_call_operand.vmem [shape: bf16[8,768], index: 1, kind: input, shape index: {}, may-alias: {0,1,2}]   ;;  %s1145_s2 = inlined_call_operand.vmem [shape: bf16[8,768], index: 2, kind: input, shape index: {}, may-alias: {0,1,2}]   ;;  %s1146_s3 = inlined_call_operand.vmem [shape: f32[1,768], index: 3, kind: input, shape index: {}, may-alias: {3,4,5}]   ;;  %s1147_s4 = inlined_call_operand.vmem [shape: f32[1,768], index: 4, kind: input, shape index: {}, may-alias: {3,4,5}]   ;;  %s1148_s5 = inlined_call_operand.vmem [shape: f32[1,768], index: 5, kind: input, shape index: {}, may-alias: {3,4,5}]   ;;  %s1149_s6 = inlined_call_operand.vmem [shape: f32[8,1], index: 6, kind: input, shape index: {}]   ;;  %s1150_s7 = inlined_call_operand.vmem [shape: f32[8,1], index: 7, kind: input, shape index: {}]   ;;  %s1151_s8 = inlined_call_operand.vmem [shape: f32[8,72], index: 8, kind: input, shape index: {}]   ;;  %s1152_s9 = inlined_call_operand.vmem [shape: f32[8,768], index: 9, kind: output, shape index: {0}]   ;;  %s1153_s10 = inlined_call_operand.vmem [shape: f32[6,16,128], index: 10, kind: output, shape index: {1}]  }
   0x1   :  { %1154 = sst [smem:[#allocation2_spill]] %s1146_s3 }
   0x2 LB: > { %s853_s14 = sadd.s32 4294967295, %s997_s13   ;;  %p861_p0 = scmp.ge.s32.totalorder %s997_s13, 1  ;;  %s997_s13 = sphi %s1064_s13, %s21_s13  }
   0x3   : > { %p404_p1 = scmp.lt.s32.totalorder %s997_s13, 7 }
   0x5   : > { %p405_p2 = pnand %p861_p0, %p404_p1 }
   0x6   : > { %s862_s17 = sadd.s32 (!%p405_p2), 4294967295, %s853_s14  ;;  %p484_p3 = scmp.lt.s32.totalorder (!%p405_p2), %s853_s14, 5 }
   0x7   : > { %408 = sbr.rel (%p405_p2) target bundleno = 774 (0x306), region = 56  ;;  %p475_p4 = scmp.gt.s32.totalorder (!%p405_p2), %s862_s17, 0 }
   0x8   : > { %p863_p5 = scmp.lt.s32.totalorder (!%p405_p2), %s862_s17, 5  ;;  %s488_s19 = sadd.s32 (!%p405_p2), 1, %s853_s14 }
   0x9   : > { %p489_p6 = scmp.lt.s32.totalorder (!%p405_p2), %s488_s19, 5  ;;  %s1155_s3 = sld [smem:[#allocation2_spill]] (!%p405_p2) }
   0xa   : > { %s1005_s28 = smov (!%p405_p2), 127   ;;  %s1006_s29 = smov (!%p405_p2), 109  }
   0xc   : > { %v537_v0 = vld [vmem:[%s1149_s6] sm:$0xff]  ;;  %v999_v1 = vmov 0   ;;  %s1075_s18 = scalar_select %p484_p3, %s853_s14, 5  ;;  %vm603_vm3 = vcmask 752640   ;;  %vm615_vm4 = vcmask 736256   ;;  %vm582_vm5 = vcmask 1031168  }
   0xd   : > { %912 = vset.pattern.permute.xlu0 %v999_v1  ;;  %s1157_s17 = smov (!%p475_p4, %s862_s17), 0  ;;  %v546_v2 = vld [vmem:[%s1150_s7] sm:$0xff]  ;;  %s1161_s19 = smov (!%p489_p6, %s488_s19), 5  ;;  %vm597_vm6 = vcmask 883712   ;;  %vm609_vm7 = vcmask 744448   ;;  %vm576_vm8 = vcmask 1039360  }
   0xe   : > { %540 = vperm.xlu0 %912, %v537_v0   ;;  %s1159_s17 = smov (!%p863_p5, %s1157_s17), 5  ;;  %s509_s27 = scalar_lea.vmem %s1147_s4, %s1075_s18  ;;  %vm588_vm9 = vcmask 900096   ;;  %vm652_vm10 = vcmask 154624   ;;  %vm670_vm11 = vcmask 588800  }
   0xf   : > { %s503_s24 = scalar_lea.vmem %s1155_s3, %s1159_s17  ;;  %s1163_s19 = smov (!%p489_p6, %s1161_s19), 5  ;;  %v1104_v19 = vld [vmem:[%s509_s27] ss:$0 sm:$0xff] }
  0x10   : > { %s515_s30 = scalar_lea.vmem %s1148_s5, %s1163_s19  ;;  %s869_s11 = sshll.u32 %s1075_s18, 2  ;;  %v988_v17 = vld [vmem:[%s503_s24] ss:$0 sm:$0xff] }
  0x11   : > { %s868_s12 = sshll.u32 %s1159_s17, 2  ;;  %s873_s14 = sshll.u32 %s1163_s19, 2  ;;  %v989_v18 = vld [vmem:[%s515_s30] ss:$0 sm:$0xff] }
  0x12   : > { %s487_s20 = scalar_lea.vmem %s1144_s1, %s869_s11  ;;  %s480_s23 = scalar_lea.vmem %s1143_s0, %s868_s12 }
  0x13   : > { %s494_s3 = scalar_lea.vmem %s1145_s2, %s873_s14  ;;  %v528_v4 = vld [vmem:[%s480_s23] sm:$0xf]  ;;  %s1001_s17 = smov 90  }
  0x14   : > { %v529_v5 = vld [vmem:[%s487_s20] sm:$0xf]  ;;  %v531_v7 = vunpack.c.l.bf16 %v528_v4  ;;  %s1002_s19 = smov 110   ;;  %s1003_s24 = smov 108  }
  0x15   : > { %v530_v6 = vld [vmem:[%s494_s3] sm:$0xf]  ;;  %v532_v8 = vunpack.c.l.bf16 %v529_v5  ;;  %s1000_s3 = smov 92   ;;  %s1004_s27 = smov 91  }
  0x16   : > { %549 = vperm.xlu0 %912, %v546_v2   ;;  %v533_v9 = vunpack.c.l.bf16 %v530_v6  ;;  %s1007_s30 = smov 126   ;;  %s1008_s11 = smov 19  }
  0x17   : > { %s883_s15 = sshll.u32 %s1075_s18, 3  ;;  %s893_s22 = sshll.u32 %s1075_s18, 4 }
  0x18   : > { %s522_s21 = scalar_lea.vmem %s1152_s9, %s883_s15  ;;  %s527_s26 = scalar_lea.vmem %s1153_s10, %s893_s22 }
  0x80   : > { %v541_v3 = vpop.permute.xlu0 %540 }
  0x81   : > { %v543_v10 = vmul.f32 %v541_v3, %v531_v7  ;;  %v544_v11 = vmul.f32 %v541_v3, %v532_v8  ;;  %v545_v12 = vmul.f32 %v541_v3, %v533_v9 }
  0x88   : > { %v550_v13 = vpop.permute.xlu0 %549 }
  0x89   : > { %v552_v14 = vadd.f32 %v550_v13, %v543_v10  ;;  %v553_v15 = vadd.f32 %v550_v13, %v544_v11  ;;  %v554_v16 = vadd.f32 %v550_v13, %v545_v12 }
  0x8b   : > { %vm555_vm0 = vcmp.gt.f32.partialorder %v552_v14, 0.0  ;;  %vm556_vm1 = vcmp.gt.f32.partialorder %v553_v15, 0.0  ;;  %vm557_vm2 = vcmp.gt.f32.partialorder %v554_v16, 0.0  ;;  %v558_v20 = vmul.f32 0.01, %v552_v14 }
  0x8c   : > { %v559_v21 = vmul.f32 0.01, %v553_v15  ;;  %v560_v22 = vmul.f32 0.01, %v554_v16 }
  0x8d   : > { %v561_v23 = vsel %vm555_vm0, %v552_v14, %v558_v20 }
  0x8e   : > { %v562_v24 = vsel %vm556_vm1, %v553_v15, %v559_v21  ;;  %v563_v25 = vsel %vm557_vm2, %v554_v16, %v560_v22  ;;  %v1106_v26 = vmul.f32 %v988_v17, %v561_v23 }
  0x8f   : > { %v568_v27 = vmul.f32 %v1104_v19, %v562_v24  ;;  %v569_v28 = vmul.f32 %v989_v18, %v563_v25 }
  0x91   : > { %v923_v29 = vpack.i.bf16 %v569_v28, %v568_v27  ;;  %v933_v30 = vpack.i.bf16 %v568_v27, %v1106_v26 }
  0x93   : > { %924 = vrot.lane.b32.xlu2 %v923_v29, %s1000_s3  ;;  %914 = vrot.lane.b32.xlu1 %v923_v29, %s1001_s17 }
  0x94   : > { %934 = vrot.lane.b32.xlu0 %v933_v30, %s1002_s19 }
  0x9b   : > { %929 = vrot.lane.b32.xlu2 %v923_v29, %s1003_s24  ;;  %919 = vrot.lane.b32.xlu1 %v923_v29, %s1004_s27 }
  0x9c   : > { %944 = vrot.lane.b32.xlu0 %v933_v30, %s1005_s28 }
  0xa3   : > { %590 = vrot.lane.b32.xlu1 %v568_v27, %s1006_s29  ;;  %939 = vrot.lane.b32.xlu2 %v933_v30, %s1007_s30 }
  0xed   : > { %v925_v31 = vpop.permute.xlu2 %924 }
  0xee   : > { %v927_v32 = vunpack.i.h.bf16 %v925_v31  ;;  %v926_v33 = vunpack.i.l.bf16 %v925_v31 }
  0xf0   : > { %v604_v34 = vsel %vm603_vm3, %v926_v33, %v927_v32 }
  0xf1   : > { %v958_v35 = vpack.i.bf16 %v604_v34, %v926_v33 }
  0xf3   : > { %959 = vrot.lane.b32.xlu0 %v958_v35, %s1008_s11 }
  0xf5   : > { %v930_v36 = vpop.permute.xlu2 %929 }
  0xf6   : > { %v932_v49 = vunpack.i.h.bf16 %v930_v36  ;;  %v931_v50 = vunpack.i.l.bf16 %v930_v36 }
  0xf8   : > { %v598_v52 = vsel %vm597_vm6, %v931_v50, %v932_v49 }
  0xf9   : > { %v963_v57 = vpack.i.bf16 %v598_v52, %v931_v50 }
  0xfd   : > { %v940_v37 = vpop.permute.xlu2 %939 }
  0xfe   : > { %v942_v38 = vunpack.i.h.bf16 %v940_v37  ;;  %v941_v39 = vunpack.i.l.bf16 %v940_v37  ;;  %v617_v37 = vld [vmem:[%s1151_s8] sm:$0xff] }
 0x100   : > { %v583_v46 = vsel %vm582_vm5, %v941_v39, %v942_v38 }
 0x105   : > { %v915_v40 = vpop.permute.xlu1 %914 }
 0x106   : > { %v917_v41 = vunpack.i.h.bf16 %v915_v40  ;;  %v916_v42 = vunpack.i.l.bf16 %v915_v40  ;;  %v935_v43 = vpop.permute.xlu0 %934 }
 0x107   : > { %v937_v44 = vunpack.i.h.bf16 %v935_v43  ;;  %v936_v61 = vunpack.i.l.bf16 %v935_v43 }
 0x108   : > { %v616_v45 = vsel %vm615_vm4, %v916_v42, %v917_v41 }
 0x109   : > { %v948_v47 = vpack.i.bf16 %v616_v45, %v916_v42  ;;  %v973_v48 = vpack.i.bf16 %v583_v46, %v937_v44  ;;  %v589_v0 = vsel %vm588_vm9, %v936_v61, %v937_v44 }
 0x10b   : > { %974 = vrot.lane.b32.xlu0 %v973_v48, %s1008_s11  ;;  %949 = vrot.lane.b32.xlu1 %v948_v47, %s1008_s11 }
 0x10d   : > { %v920_v51 = vpop.permute.xlu1 %919 }
 0x10e   : > { %v922_v53 = vunpack.i.h.bf16 %v920_v51  ;;  %v921_v54 = vunpack.i.l.bf16 %v920_v51  ;;  %v945_v55 = vpop.permute.xlu0 %944 }
 0x10f   : > { %v947_v59 = vunpack.i.h.bf16 %v945_v55  ;;  %v946_v60 = vunpack.i.l.bf16 %v945_v55 }
 0x110   : > { %v610_v56 = vsel %vm609_vm7, %v921_v54, %v922_v53 }
 0x111   : > { %v953_v58 = vpack.i.bf16 %v610_v56, %v921_v54  ;;  %v577_v62 = vsel %vm576_vm8, %v946_v60, %v947_v59  ;;  %v983_v3 = vpack.i.bf16 %v1106_v26, %v947_v59 }
 0x112   : > { %v978_v1 = vpack.i.bf16 %v577_v62, %v942_v38 }
 0x113   : > { %620 = vrot.lane.b32.xlu0 %v568_v27, %s1008_s11  ;;  %964 = vrot.lane.b32.xlu1 %v963_v57, %s1008_s11 }
 0x114   : > { %954 = vrot.lane.b32.xlu2 %v953_v58, %s1008_s11 }
 0x115   : > { %v591_v63 = vpop.permute.xlu1 %590 }
 0x116   : > { %v968_v2 = vpack.i.bf16 %v589_v0, %v591_v63 }
 0x11b   : > { %979 = vrot.lane.b32.xlu1 %v978_v1, %s1008_s11 }
 0x11c   : > { %969 = vrot.lane.b32.xlu2 %v968_v2, %s1008_s11 }
 0x124   : > { %984 = vrot.lane.b32.xlu2 %v983_v3, %s1008_s11 }
 0x165   : > { %v960_v5 = vpop.permute.xlu0 %959 }
 0x166   : > { %v962_v11 = vunpack.i.h.bf16 %v960_v5  ;;  %v961_v12 = vunpack.i.l.bf16 %v960_v5 }
 0x168   : > { %v658_v16 = vsel %vm652_vm10, %v961_v12, %v962_v11 }
 0x16e   : > { %v955_v4 = vpop.permute.xlu2 %954 }
 0x16f   : > { %v957_v7 = vunpack.i.h.bf16 %v955_v4  ;;  %v956_v8 = vunpack.i.l.bf16 %v955_v4 }
 0x171   : > { %v659_v14 = vsel %vm652_vm10, %v956_v8, %v957_v7 }
 0x176   : > { %v970_v15 = vpop.permute.xlu2 %969 }
 0x177   : > { %v971_v24 = vunpack.i.l.bf16 %v970_v15  ;;  %v972_v25 = vunpack.i.h.bf16 %v970_v15 }
 0x17d   : > { %v950_v6 = vpop.permute.xlu1 %949  ;;  %v975_v17 = vpop.permute.xlu0 %974 }
 0x17e   : > { %v952_v9 = vunpack.i.h.bf16 %v950_v6  ;;  %v951_v10 = vunpack.i.l.bf16 %v950_v6  ;;  %v976_v22 = vunpack.i.l.bf16 %v975_v17  ;;  %v985_v27 = vpop.permute.xlu2 %984  ;;  %v977_v29 = vunpack.i.h.bf16 %v975_v17 }
 0x17f   : > { %v986_v32 = vunpack.i.l.bf16 %v985_v27  ;;  %v987_v35 = vunpack.i.h.bf16 %v985_v27 }
 0x180   : > { %v660_v13 = vsel %vm652_vm10, %v951_v10, %v952_v9  ;;  %v656_v26 = vsel %vm652_vm10, %v972_v25, %v976_v22 }
 0x181   : > { %681 = vmatpush.msra.mxu0 %v660_v13 }
 0x183   : > { %682 = vmatpush.msra.mxu0 %v659_v14 }
 0x185   : > { %v965_v18 = vpop.permute.xlu1 %964  ;;  %683 = vmatpush.msra.mxu0 %v658_v16  ;;  %v621_v34 = vpop.permute.xlu0 %620 }
 0x186   : > { %v967_v20 = vunpack.i.h.bf16 %v965_v18  ;;  %v966_v21 = vunpack.i.l.bf16 %v965_v18  ;;  %v653_v38 = vsel %vm652_vm10, %v987_v35, %v621_v34 }
 0x188   : > { %v657_v23 = vsel %vm652_vm10, %v966_v21, %v967_v20 }
 0x189   : > { %684 = vmatpush.msra.mxu0 %v657_v23 }
 0x18b   : > { %685 = vmatpush.msra.mxu0 %v971_v24 }
 0x18d   : > { %v980_v28 = vpop.permute.xlu1 %979  ;;  %686 = vmatpush.msra.mxu0 %v656_v26 }
 0x18e   : > { %v982_v30 = vunpack.i.h.bf16 %v980_v28  ;;  %v981_v31 = vunpack.i.l.bf16 %v980_v28 }
 0x190   : > { %v655_v33 = vsel %vm652_vm10, %v977_v29, %v981_v31  ;;  %v654_v36 = vsel %vm652_vm10, %v982_v30, %v986_v32 }
 0x191   : > { %687 = vmatpush.msra.mxu0 %v655_v33 }
 0x193   : > { %688 = vmatpush.msra.mxu0 %v654_v36 }
 0x195   : > { %689 = vmatpush.msra.mxu0 %v653_v38 }
 0x196   : > { %886 = vmatmul.msk.f32.vlgmr.msra.gmra.mxu0 %vm670_vm11, %v617_v37 }
 0x213   : > { %v691_v39 = vpop.f32.mrf.mxu0 }
 0x214   : > { %v697_v40 = vmul.f32 %v1104_v19, %v691_v39 }
 0x216   : > { %698 = vst [vmem:[%s522_s21] sm:$0xff] %v697_v40  ;;  %699 = vadd.xlane.f32.xlu1 %v697_v40  ;;  %v701_v41 = vmul.f32 %v697_v40, %v697_v40 }
 0x218   : > { %702 = vadd.xlane.f32.xlu2 %v701_v41 }
 0x289   : > { %v700_v42 = vpop.xlane.xlu1 %699 }
 0x28a   : > { %706 = vperm.xlu0 %912, %v700_v42  }
 0x28b   : > { %v703_v43 = vpop.xlane.xlu2 %702 }
 0x292   : > { %711 = vperm.xlu0 %912, %v703_v43  }
 0x2fc   : > { %v707_v44 = vpop.permute.xlu0 %706 }
 0x2fd   : > { %714 = vst [vmem:[%s527_s26] sm:$0xff] %v707_v44 }
 0x304   : > { %v712_v45 = vpop.permute.xlu0 %711 }
 0x305   : > { %715 = vst [vmem:[%s527_s26 + $0x8] sm:$0xff] %v712_v45 }
 0x306 PF: > { %s21_s13 = sadd.s32 1, %s997_s13  }
 0x307   : > { %p18_p7 = scmp.ge.s32.totalorder %s21_s13, 8  }
 0x309   :  { %20 = sbr.rel (!%p18_p7) target bundleno = 2 (0x2), region = 113 }

</bundles_post_ra>
